<compile_context>
chip_gen: v6e
topology: v6e:2x2x1
jax: 0.10.0
libtpu: 0.0.40
codegen_flags: <defaults>
</compile_context>

<pallas_src>
import functools

import jax
import jax.numpy as jnp
from jax.experimental import pallas as pl
from jax.experimental.pallas import tpu as pltpu


def _round_up(x, m):
    return ((x + m - 1) // m) * m


def _qnet_kernel(x_ref, w1_ref, b1_ref, w2_ref, b2_ref, o_ref):
    # Hidden layer: h = relu(x @ W1 + b1)   (f32 accumulate, f32 elementwise)
    h = jnp.dot(x_ref[...], w1_ref[...], preferred_element_type=jnp.float32)
    h = jnp.maximum(h + b1_ref[...], 0.0)
    # Output layer: y = h @ W2 + b2
    y = jnp.dot(h.astype(w2_ref.dtype), w2_ref[...],
                preferred_element_type=jnp.float32)
    o_ref[...] = (y + b2_ref[...]).astype(o_ref.dtype)


def prepare_params(w1, b1, w2, b2, *, compute_dtype=jnp.float32):
    """One-time conversion from PyTorch layout to padded kernel layout.

    w1: (hidden, in)  b1: (hidden,)  w2: (out, hidden)  b2: (out,)
    Returns a dict of device arrays already in the layout the kernel consumes.
    Do this once at init, NOT per forward call.
    """
    hidden, in_size = w1.shape
    out_size = w2.shape[0]

    in_pad = _round_up(in_size, 8)       # sublane-aligned contraction dim
    hid_pad = _round_up(hidden, 128)     # lane-dense hidden dim
    out_pad = _round_up(out_size, 128)   # lane-dense output -> unmasked stores

    w1_t = jnp.zeros((in_pad, hid_pad), compute_dtype).at[:in_size, :hidden].set(
        w1.T.astype(compute_dtype))
    w2_t = jnp.zeros((hid_pad, out_pad), compute_dtype).at[:hidden, :out_size].set(
        w2.T.astype(compute_dtype))
    # Biases stay f32 (elementwise math is done in f32 inside the kernel).
    b1_r = jnp.zeros((1, hid_pad), jnp.float32).at[0, :hidden].set(
        b1.astype(jnp.float32))
    b2_r = jnp.zeros((1, out_pad), jnp.float32).at[0, :out_size].set(
        b2.astype(jnp.float32))

    return dict(
        w1=w1_t, b1=b1_r, w2=w2_t, b2=b2_r,
        in_size=in_size, in_pad=in_pad,
        hidden=hidden, hid_pad=hid_pad,
        out_size=out_size, out_pad=out_pad,
        compute_dtype=compute_dtype,
    )


@functools.partial(jax.jit, static_argnames=("block_b",))
def _forward_impl(x, w1, b1, w2, b2, *, block_b):
    # x is already padded to (B_pad, in_pad) with B_pad % tile == 0.
    B_pad, in_pad = x.shape
    hid_pad = w1.shape[1]
    out_pad = w2.shape[1]
    tb = min(block_b, B_pad)
    num_blocks = B_pad // tb

    return pl.pallas_call(
        _qnet_kernel,
        out_shape=jax.ShapeDtypeStruct((B_pad, out_pad), jnp.float32),
        grid=(num_blocks,),
        in_specs=[
            pl.BlockSpec((tb, in_pad), lambda i: (i, 0)),        # x: batch-tiled
            pl.BlockSpec((in_pad, hid_pad), lambda i: (0, 0)),   # w1: resident
            pl.BlockSpec((1, hid_pad), lambda i: (0, 0)),        # b1: resident
            pl.BlockSpec((hid_pad, out_pad), lambda i: (0, 0)),  # w2: resident
            pl.BlockSpec((1, out_pad), lambda i: (0, 0)),        # b2: resident
        ],
        out_specs=pl.BlockSpec((tb, out_pad), lambda i: (i, 0)),
        compiler_params=pltpu.CompilerParams(
            dimension_semantics=("parallel",),
        ),
    )(x, w1, b1, w2, b2)


def linear_qnet_forward(x, params, *, block_b=256):
    """Fused 2-layer MLP forward.  x: (B, in_features) float32.

    params: dict from prepare_params (padded, kernel-layout weights).
    block_b: batch tile (multiple of 8; 256-512 is a good default).
    """
    B, in_size = x.shape
    assert in_size == params["in_size"]
    in_pad = params["in_pad"]

    # Batch tile: small batches collapse to a single padded tile; large
    # batches round up to a multiple of block_b.
    if B <= block_b:
        b_pad = _round_up(B, 8)
    else:
        b_pad = _round_up(B, block_b)

    x_p = jnp.zeros((b_pad, in_pad), params["compute_dtype"])
    x_p = x_p.at[:B, :in_size].set(x.astype(params["compute_dtype"]))

    out_padded = _forward_impl(
        x_p, params["w1"], params["b1"], params["w2"], params["b2"],
        block_b=block_b)
    return out_padded[:B, :params["out_size"]].astype(x.dtype)


def init_params(key, input_size, hidden_size, output_size):
    """PyTorch-layout init mimicking nn.Linear default U(-1/sqrt(fan_in), +1/sqrt(fan_in))."""
    k1, k2, k3, k4 = jax.random.split(key, 4)
    bound1 = 1.0 / jnp.sqrt(jnp.float32(input_size))
    bound2 = 1.0 / jnp.sqrt(jnp.float32(hidden_size))
    w1 = jax.random.uniform(k1, (hidden_size, input_size), jnp.float32, -bound1, bound1)
    b1 = jax.random.uniform(k2, (hidden_size,), jnp.float32, -bound1, bound1)
    w2 = jax.random.uniform(k3, (output_size, hidden_size), jnp.float32, -bound2, bound2)
    b2 = jax.random.uniform(k4, (output_size,), jnp.float32, -bound2, bound2)
    return w1, b1, w2, b2


if __name__ == "__main__":
    # Snake-game QNet dims.
    input_size, hidden_size, output_size = 11, 32, 3

    key = jax.random.PRNGKey(0)
    kx, kx2, kp = jax.random.split(key, 3)
    w1, b1, w2, b2 = init_params(kp, input_size, hidden_size, output_size)

    # One-time param conversion (transposes/padding happen here, not per call).
    # For big replay batches on v6e/v7x, pass compute_dtype=jnp.bfloat16.
    params = prepare_params(w1, b1, w2, b2, compute_dtype=jnp.float32)

    def ref(x):
        return jnp.maximum(x @ w1.T + b1, 0.0) @ w2.T + b2

    # Case 1: tiny inference batch (single game step).
    x_small = jax.random.normal(kx, (2, input_size), jnp.float32)
    out_small = jax.block_until_ready(linear_qnet_forward(x_small, params))
    assert out_small.shape == (2, output_size)
    assert jnp.allclose(out_small, ref(x_small), atol=1e-5, rtol=1e-5)

    # Case 2: small training-style batch exercising the batch grid.
    x_batch = jax.random.normal(kx2, (64, input_size), jnp.float32)
    out_batch = jax.block_until_ready(linear_qnet_forward(x_batch, params))
    assert out_batch.shape == (64, output_size)
    assert jnp.allclose(out_batch, ref(x_batch), atol=1e-5, rtol=1e-5)

    print("KERNEL_OK")
</pallas_src>

<mosaic_0001>
module attributes {stable_mosaic.version = 11 : i64} {
  func.func @_qnet_kernel(%arg0: i32, %arg1: memref<8x16xf32, #tpu.memory_space<vmem>>, %arg2: memref<16x128xf32, #tpu.memory_space<vmem>>, %arg3: memref<1x128xf32, #tpu.memory_space<vmem>>, %arg4: memref<128x128xf32, #tpu.memory_space<vmem>>, %arg5: memref<1x128xf32, #tpu.memory_space<vmem>>, %arg6: memref<8x128xf32, #tpu.memory_space<vmem>>) attributes {dimension_semantics = [#tpu.dimension_semantics<parallel>], iteration_bounds = array<i64: 1>, scalar_prefetch = 0 : i64, scratch_operands = 0 : i64, tpu.core_type = #tpu.core_type<tc>, window_params = [{transform_indices = @transform_0, window_bounds = array<i64: 8, 16>}, {pipeline_mode = #tpu.pipeline_mode<synchronous>, transform_indices = @transform_1, window_bounds = array<i64: 16, 128>}, {pipeline_mode = #tpu.pipeline_mode<synchronous>, transform_indices = @transform_2, window_bounds = array<i64: 1, 128>}, {pipeline_mode = #tpu.pipeline_mode<synchronous>, transform_indices = @transform_3, window_bounds = array<i64: 128, 128>}, {pipeline_mode = #tpu.pipeline_mode<synchronous>, transform_indices = @transform_4, window_bounds = array<i64: 1, 128>}, {transform_indices = @transform_5, window_bounds = array<i64: 8, 128>}]} {
    %c0 = arith.constant 0 : index
    %c0_0 = arith.constant 0 : index
    %0 = vector.load %arg1[%c0, %c0_0] : memref<8x16xf32, #tpu.memory_space<vmem>>, vector<8x16xf32>
    %c0_1 = arith.constant 0 : index
    %c0_2 = arith.constant 0 : index
    %1 = vector.load %arg2[%c0_1, %c0_2] : memref<16x128xf32, #tpu.memory_space<vmem>>, vector<16x128xf32>
    %cst = arith.constant dense<0.000000e+00> : vector<8x128xf32>
    %2 = tpu.matmul %0, %1, %cst {dimension_numbers = #tpu.dot_dimension_numbers<[1], [0], [0], [1], [0, 0, 1, 1], [], []>} : vector<8x16xf32>, vector<16x128xf32>, vector<8x128xf32> -> vector<8x128xf32>
    %c0_3 = arith.constant 0 : index
    %c0_4 = arith.constant 0 : index
    %3 = vector.load %arg3[%c0_3, %c0_4] : memref<1x128xf32, #tpu.memory_space<vmem>>, vector<1x128xf32>
    %4 = vector.broadcast %3 : vector<1x128xf32> to vector<8x128xf32>
    %5 = arith.addf %2, %4 : vector<8x128xf32>
    %cst_5 = arith.constant 0.000000e+00 : f32
    %6 = vector.broadcast %cst_5 : f32 to vector<8x128xf32>
    %7 = arith.maximumf %5, %6 : vector<8x128xf32>
    %c0_6 = arith.constant 0 : index
    %c0_7 = arith.constant 0 : index
    %8 = vector.load %arg4[%c0_6, %c0_7] : memref<128x128xf32, #tpu.memory_space<vmem>>, vector<128x128xf32>
    %cst_8 = arith.constant dense<0.000000e+00> : vector<8x128xf32>
    %9 = tpu.matmul %7, %8, %cst_8 {dimension_numbers = #tpu.dot_dimension_numbers<[1], [0], [0], [1], [0, 0, 1, 1], [], []>} : vector<8x128xf32>, vector<128x128xf32>, vector<8x128xf32> -> vector<8x128xf32>
    %c0_9 = arith.constant 0 : index
    %c0_10 = arith.constant 0 : index
    %10 = vector.load %arg5[%c0_9, %c0_10] : memref<1x128xf32, #tpu.memory_space<vmem>>, vector<1x128xf32>
    %11 = vector.broadcast %10 : vector<1x128xf32> to vector<8x128xf32>
    %12 = arith.addf %9, %11 : vector<8x128xf32>
    %c0_11 = arith.constant 0 : index
    %c0_12 = arith.constant 0 : index
    %13 = vector.load %arg6[%c0_11, %c0_12] : memref<8x128xf32, #tpu.memory_space<vmem>>, vector<8x128xf32>
    tpu.vector_store %arg6[%c0_11, %c0_12], %12 {strides = array<i32>} : memref<8x128xf32, #tpu.memory_space<vmem>>, vector<8x128xf32>,
    return
  }
  func.func @transform_0(%arg0: i32) -> (i32, i32) {
    %c0_i32 = arith.constant 0 : i32
    %c0_i32_0 = arith.constant 0 : i32
    return %arg0, %c0_i32 : i32, i32
  }
  func.func @transform_1(%arg0: i32) -> (i32, i32) {
    %c0_i32 = arith.constant 0 : i32
    %c0_i32_0 = arith.constant 0 : i32
    %c0_i32_1 = arith.constant 0 : i32
    return %c0_i32, %c0_i32_0 : i32, i32
  }
  func.func @transform_2(%arg0: i32) -> (i32, i32) {
    %c0_i32 = arith.constant 0 : i32
    %c0_i32_0 = arith.constant 0 : i32
    %c0_i32_1 = arith.constant 0 : i32
    return %c0_i32, %c0_i32_0 : i32, i32
  }
  func.func @transform_3(%arg0: i32) -> (i32, i32) {
    %c0_i32 = arith.constant 0 : i32
    %c0_i32_0 = arith.constant 0 : i32
    %c0_i32_1 = arith.constant 0 : i32
    return %c0_i32, %c0_i32_0 : i32, i32
  }
  func.func @transform_4(%arg0: i32) -> (i32, i32) {
    %c0_i32 = arith.constant 0 : i32
    %c0_i32_0 = arith.constant 0 : i32
    %c0_i32_1 = arith.constant 0 : i32
    return %c0_i32, %c0_i32_0 : i32, i32
  }
  func.func @transform_5(%arg0: i32) -> (i32, i32) {
    %c0_i32 = arith.constant 0 : i32
    %c0_i32_0 = arith.constant 0 : i32
    return %arg0, %c0_i32 : i32, i32
  }
}

</mosaic_0001>

<bundles_post_ra>
// kernel: _forward_impl.1
= control target key start
LH: loop header
LB: loop body
LE: loop exit
PB: predicated region body
PF: predicated region fallthrough
CT: control target
= control target key end

     0   :  { %10 = vsyncpa [#allocation3], 0  ;;  %s470_s0 = inlined_call_operand.hbm [shape: f32[8,16], index: 0, kind: input, shape index: {}]   ;;  %s471_s1 = inlined_call_operand.hbm [shape: f32[16,128], index: 1, kind: input, shape index: {}]   ;;  %s472_s2 = inlined_call_operand.vmem [shape: f32[1,128], index: 2, kind: input, shape index: {}]   ;;  %s473_s3 = inlined_call_operand.hbm [shape: f32[128,128], index: 3, kind: input, shape index: {}]   ;;  %s474_s4 = inlined_call_operand.vmem [shape: f32[1,128], index: 4, kind: input, shape index: {}]   ;;  %s475_s5 = inlined_call_operand.hbm [shape: f32[8,128], index: 5, kind: output, shape index: {}]  }
   0x1   :  { %11 = vsyncpa [#allocation6], 0 }
   0x2   :  { %12 = vsyncpa [#allocation4], 0  ;;  %s414_s18 = smov [#allocation5]  }
   0x3   :  { %s28_s19 = sshll.u32 %s414_s18, 4  ;;  %s29_s19 = int_to_ptr.vmem [resolvable:$true] %s28_s19 }
   0x4   :  { %s336_s20 = scalar_lea.vmem %s29_s19, 256  ;;  %p341_p1 = scmp.lt.s32.totalorder %s29_s19, %s29_s19 }
   0x5   :  { %p337_p0 = scmp.ne.s32.totalorder %s29_s19, %s336_s20  ;;  %p342_p2 = scmp.lt.s32.totalorder %s336_s20, %s336_s20 }
   0x7   :  { %p343_p3 = por %p342_p2, %p341_p1 }
   0x9   :  { %p344_p4 = pnand %p343_p3, %p337_p0 }
   0xb   :  { %347 = shalt.err (!%p344_p4)
}
   0xc   :  { %s415_s21 = smov 128   ;;  %s416_s22 = smov 8  }
   0xd   :  { %34 = dma.hbm_to_vmem [thread:$0]  %s471_s1, 256, %s29_s19, [#allocation6], %s415_s21, %s415_s21, %s416_s22  }
   0xe   :  { %s417_s25 = smov [#allocation2]   ;;  %s418_s27 = smov [#allocation7]  }
   0xf   :  { %s19_s26 = sshll.u32 %s417_s25, 4  ;;  %s42_s28 = sshll.u32 %s418_s27, 4  ;;  %s20_s26 = int_to_ptr.vmem [resolvable:$true] %s19_s26  ;;  %s43_s28 = int_to_ptr.vmem [resolvable:$true] %s42_s28 }
  0x10   :  { %s356_s29 = scalar_lea.vmem %s20_s26, 128  ;;  %p361_p6 = scmp.lt.s32.totalorder %s20_s26, %s20_s26 }
  0x11   :  { %p357_p5 = scmp.ne.s32.totalorder %s20_s26, %s356_s29  ;;  %p362_p7 = scmp.lt.s32.totalorder %s356_s29, %s356_s29 }
  0x13   :  { %p363_p8 = por %p362_p7, %p361_p6 }
  0x15   :  { %p364_p9 = pnand %p363_p8, %p357_p5 }
  0x17   :  { %367 = shalt.err (!%p364_p9)
}
  0x18   :  { %22 = dma.hbm_to_vmem [thread:$0]  %s470_s0, 128, %s20_s26, [#allocation3]  }
  0x19   :  { %s376_s7 = scalar_lea.vmem %s43_s28, 2048  ;;  %p381_p11 = scmp.lt.s32.totalorder %s43_s28, %s43_s28 }
  0x1a   :  { %p377_p10 = scmp.ne.s32.totalorder %s43_s28, %s376_s7  ;;  %p382_p12 = scmp.lt.s32.totalorder %s376_s7, %s376_s7 }
  0x1c   :  { %p383_p13 = por %p382_p12, %p381_p11 }
  0x1e   :  { %p384_p0 = pnand %p383_p13, %p377_p10 }
  0x20   :  { %387 = shalt.err (!%p384_p0)
}
  0x21   :  { %48 = dma.hbm_to_vmem [thread:$0]  %s473_s3, 2048, %s43_s28, [#allocation6], %s415_s21, %s415_s21, %s416_s22  }
  0x22   :  { %408 = dma.done.wait [#allocation3], 128  }
  0x23   :  { %409 = vsyncadd [#allocation3], 4294967168 }
  0x24   :  { %410 = dma.done.wait [#allocation6], 2304  }
  0x25   :  { %411 = vsyncadd [#allocation6], 4294964992  ;;  %v419_v0 = vmov 0.0   ;;  %vm420_vm0 = vmmov 0   ;;  %v62_v1 = vld [vmem:[#allocation5 + $0x8] sm:$0xff]  ;;  %v61_v2 = vld [vmem:[#allocation5] sm:$0xff] }
  0x26   :  { %278 = vmatprep.subr.mxu0 %v419_v0  ;;  %282 = vmatprep.mubr.msk.f32.mxu0 %vm420_vm0, %v419_v0  ;;  %v60_v3 = vld [vmem:[#allocation2] sm:$0xff]  ;;  %vm70_vm1 = vcmask 130048   ;;  %v160_v4 = vld [vmem:[#allocation7 + $0x78] sm:$0xff]  ;;  %v159_v5 = vld [vmem:[#allocation7 + $0x70] sm:$0xff]  ;;  %s421_s11 = smov [#allocation8]  }
  0x27   :  { %285 = vmatprep.subr.mxu1 %v419_v0  ;;  %317 = vmatprep.mubr.msk.f32.mxu1 %vm420_vm0, %v419_v0  ;;  %v158_v6 = vld [vmem:[#allocation7 + $0x68] sm:$0xff]  ;;  %v157_v7 = vld [vmem:[#allocation7 + $0x60] sm:$0xff]  ;;  %v156_v8 = vld [vmem:[#allocation7 + $0x58] sm:$0xff]  ;;  %s245_s12 = sshll.u32 %s421_s11, 4  ;;  %s246_s12 = int_to_ptr.vmem [resolvable:$true] %s245_s12 }
  0x28   :  { %279 = vmatpush3.msra.mxu0 %v62_v1  ;;  %286 = vmatpush3.msra.mxu1 %v160_v4  ;;  %v155_v9 = vld [vmem:[#allocation7 + $0x50] sm:$0xff]  ;;  %v154_v10 = vld [vmem:[#allocation7 + $0x48] sm:$0xff]  ;;  %v153_v11 = vld [vmem:[#allocation7 + $0x40] sm:$0xff]  ;;  %s388_s13 = scalar_lea.vmem %s246_s12, 128  ;;  %p393_p2 = scmp.lt.s32.totalorder %s246_s12, %s246_s12 }
  0x29   :  { %280 = vmatprep.subr.mxu0 %v419_v0  ;;  %287 = vmatprep.subr.mxu1 %v419_v0  ;;  %v152_v12 = vld [vmem:[#allocation7 + $0x38] sm:$0xff]  ;;  %v151_v13 = vld [vmem:[#allocation7 + $0x30] sm:$0xff]  ;;  %v150_v14 = vld [vmem:[#allocation7 + $0x28] sm:$0xff]  ;;  %p389_p1 = scmp.ne.s32.totalorder %s246_s12, %s388_s13  ;;  %p394_p3 = scmp.lt.s32.totalorder %s388_s13, %s388_s13 }
  0x2a   :  { %281 = vmatpush3.msra.mxu0 %v61_v2  ;;  %288 = vmatpush3.msra.mxu1 %v159_v5  ;;  %v149_v15 = vld [vmem:[#allocation7 + $0x20] sm:$0xff]  ;;  %v148_v16 = vld [vmem:[#allocation7 + $0x18] sm:$0xff]  ;;  %v147_v17 = vld [vmem:[#allocation7 + $0x10] sm:$0xff] }
  0x2b   :  { %283 = vmatmul.mubr.msk.f32.vlgmr.msra.gmra.mxu0 %vm70_vm1, %v60_v3  ;;  %289 = vmatprep.subr.mxu1 %v419_v0  ;;  %v146_v18 = vld [vmem:[#allocation7 + $0x8] sm:$0xff]  ;;  %v145_v19 = vld [vmem:[#allocation7] sm:$0xff]  ;;  %p395_p4 = por %p394_p3, %p393_p2 }
  0x2c   :  { %290 = vmatpush3.msra.mxu1 %v158_v6  ;;  %v255_v20 = vld [vmem:[%s472_s2] ss:$0 sm:$0xff] }
  0x2d   :  { %291 = vmatprep.subr.mxu1 %v419_v0  ;;  %v257_v25 = vld [vmem:[%s474_s4] ss:$0 sm:$0xff]  ;;  %p396_p5 = pnand %p395_p4, %p389_p1 }
  0x2e   :  { %292 = vmatpush3.msra.mxu1 %v157_v7 }
  0x2f   :  { %293 = vmatprep.subr.mxu1 %v419_v0 }
  0x30   :  { %294 = vmatpush3.msra.mxu1 %v156_v8 }
  0x31   :  { %295 = vmatprep.subr.mxu1 %v419_v0 }
  0x32   :  { %296 = vmatpush3.msra.mxu1 %v155_v9 }
  0x33   :  { %297 = vmatprep.subr.mxu1 %v419_v0 }
  0x34   :  { %298 = vmatpush3.msra.mxu1 %v154_v10 }
  0x35   :  { %299 = vmatprep.subr.mxu1 %v419_v0 }
  0x36   :  { %300 = vmatpush3.msra.mxu1 %v153_v11 }
  0x37   :  { %301 = vmatprep.subr.mxu1 %v419_v0 }
  0x38   :  { %302 = vmatpush3.msra.mxu1 %v152_v12 }
  0x39   :  { %303 = vmatprep.subr.mxu1 %v419_v0 }
  0x3a   :  { %304 = vmatpush3.msra.mxu1 %v151_v13 }
  0x3b   :  { %305 = vmatprep.subr.mxu1 %v419_v0 }
  0x3c   :  { %306 = vmatpush3.msra.mxu1 %v150_v14 }
  0x3d   :  { %307 = vmatprep.subr.mxu1 %v419_v0 }
  0x3e   :  { %308 = vmatpush3.msra.mxu1 %v149_v15 }
  0x3f   :  { %309 = vmatprep.subr.mxu1 %v419_v0 }
  0x40   :  { %310 = vmatpush3.msra.mxu1 %v148_v16 }
  0x41   :  { %311 = vmatprep.subr.mxu1 %v419_v0 }
  0x42   :  { %312 = vmatpush3.msra.mxu1 %v147_v17 }
  0x43   :  { %313 = vmatprep.subr.mxu1 %v419_v0 }
  0x44   :  { %314 = vmatpush3.msra.mxu1 %v146_v18 }
  0x45   :  { %315 = vmatprep.subr.mxu1 %v419_v0 }
  0x46   :  { %316 = vmatpush3.msra.mxu1 %v145_v19 }
  0xeb   :  { %v140_v21 = vpop.f32.mrf.mxu0 }
  0xec   :  { %v141_v22 = vadd.f32 %v255_v20, %v140_v21 }
  0xed   :  { %v284_v23 = vpop.f32.mrf.mxu0 }
  0xee   :  { %v144_v24 = vmax.f32 %v141_v22, 0.0 }
  0xf0   :  { %318 = vmatmul.mubr.f32.vlgmr.msra.gmra.mxu1 %v144_v24 }
 0x1b0   :  { %v234_v26 = vpop.f32.mrf.mxu1 }
 0x1b1   :  { %v235_v27 = vadd.f32 %v257_v25, %v234_v26 }
 0x1b2   :  { %v319_v28 = vpop.f32.mrf.mxu1 }
 0x1b3   :  { %238 = vst [vmem:[#allocation8] sm:$0xff] %v235_v27 }
 0x1b4   :  { %399 = shalt.err (!%p396_p5)
}
 0x1b5   :  { %248 = dma.vmem_to_hbm [thread:$0]  %s246_s12, 128, %s475_s5, [#allocation4]  }
 0x1b6   :  { %412 = dma.done.wait [#allocation4], 128  }
 0x1b7   :  { %413 = vsyncadd [#allocation4], 4294967168 }
 0x1b8   :  { %252 = vsyncpa [#allocation3], 1 }
 0x1b9   :  { %253 = vsyncpa [#allocation6], 1 }
 0x1ba   :  { %254 = vsyncpa [#allocation4], 1 }

</bundles_post_ra>
